<compile_context>
chip_gen: v7x
topology: tpu7x:2x2x1
jax: 0.10.0
libtpu: 0.0.40
codegen_flags: <defaults>
</compile_context>

<pallas_src>
import jax
import jax.numpy as jnp
from jax import lax
from jax.experimental import pallas as pl
from jax.experimental.pallas import tpu as pltpu


_VMEM_LIMIT = 48 * 1024 * 1024     # explicit scoped-VMEM limit, safe on v5e/v6e/v7x
_GRAM_BUDGET = 32 * 1024 * 1024    # per-step working set for the one-shot kernels
_HOT_BUDGET = 36 * 1024 * 1024     # per-step working set for the hot matmul
_W_TILE_BUDGET = 16 * 1024 * 1024  # of which: double-buffered weight tile


def _round_up(x, m):
    return ((x + m - 1) // m) * m


def _round_down(x, m):
    return (x // m) * m


# ---------------------------------------------------------------------------
# Kernel 1 (one-shot, tiled): rowsum_i = sum_j |<W[:, i], W[:, j]>|
# ---------------------------------------------------------------------------
def _gram_rowsum_kernel(wa_ref, wb_ref, rs_ref):
    @pl.when(pl.program_id(1) == 0)
    def _():
        rs_ref[...] = jnp.zeros_like(rs_ref)

    # g[a, b] = <W[:, j_a], W[:, i_b]>   -> (t_g, t_g)
    g = lax.dot_general(wb_ref[...], wa_ref[...], (((0,), (0,)), ((), ())),
                        preferred_element_type=jnp.float32)
    # sum over the j-block (sublane reduction), accumulate per i lane.
    rs_ref[...] += jnp.sum(jnp.abs(g), axis=0, keepdims=True)


# ---------------------------------------------------------------------------
# Kernel 2 (one-shot, tiled): fold scale into the transposed weight.
# ---------------------------------------------------------------------------
def _fold_scale_kernel(wt_ref, rs_ref, q_ref, out_ref):
    # f == exp(-q)*exp(q) ~= 1, kept for parity with the torch expression.
    f = jnp.exp(-q_ref[...]) * jnp.exp(q_ref[...])        # (cin, 1)
    scale = jnp.sqrt(1.0 / (f * rs_ref[...]))             # (cin, 1)
    out_ref[...] = (wt_ref[...] * scale).astype(out_ref.dtype)


# ---------------------------------------------------------------------------
# Kernel 3 (hot): one (M, N) tile of  out = x @ Wt_scaled + b.
# ---------------------------------------------------------------------------
def _matmul_bias_kernel(x_ref, wt_ref, b_ref, o_ref):
    # (tm, cin) @ (cin, tn) — canonical (M,K)@(K,N) feed for the MXU.
    acc = jnp.dot(x_ref[...], wt_ref[...], preferred_element_type=jnp.float32)
    o_ref[...] = (acc + b_ref[...]).astype(o_ref.dtype)


def sdp_linear(x, weights, bias, q):
    """x: (..., cin); weights: (cout, cin); bias: (cout,); q: (cin,)."""
    cout, cin = weights.shape
    lead = x.shape[:-1]
    x2 = x.reshape(-1, cin)
    m = x2.shape[0]

    cout_p = _round_up(cout, 128)                                  # lane-dense N
    w_p = jnp.pad(weights, ((0, cout_p - cout), (0, 0)))           # (cout_p, cin)
    b_p = jnp.pad(bias, (0, cout_p - cout)).reshape(1, cout_p)     # (1, cout_p)

    # ---- 1. Gram row-sums, tiled over cin blocks ----------------------------
    t_g = _round_down(max(_GRAM_BUDGET // (16 * cout_p), 128), 128)
    t_g = min(t_g, 512)
    if cin <= t_g:
        t_g, cin_g, w_g = cin, cin, w_p           # single full-dim block, no cin pad
    else:
        cin_g = _round_up(cin, t_g)               # exact blocks (no ragged reduction)
        w_g = jnp.pad(w_p, ((0, 0), (0, cin_g - cin)))
    n_g = cin_g // t_g

    rowsum = pl.pallas_call(
        _gram_rowsum_kernel,
        out_shape=jax.ShapeDtypeStruct((1, cin_g), jnp.float32),
        grid_spec=pltpu.PrefetchScalarGridSpec(
            num_scalar_prefetch=0,
            grid=(n_g, n_g),                       # j (reduction) innermost
            in_specs=[
                pl.BlockSpec((cout_p, t_g), lambda i, j: (0, i)),   # i column block
                pl.BlockSpec((cout_p, t_g), lambda i, j: (0, j)),   # j column block
            ],
            out_specs=pl.BlockSpec((1, t_g), lambda i, j: (0, i)),
        ),
        compiler_params=pltpu.CompilerParams(
            dimension_semantics=("parallel", "arbitrary"),
            vmem_limit_bytes=_VMEM_LIMIT),
    )(w_g, w_g)
    rowsum_col = rowsum[:, :cin].reshape(cin, 1)

    # ---- 2. Fold the SDP scale into the transposed weight -------------------
    w_t = w_p.T                                   # (cin, cout_p): one-time layout transpose
    q_col = q.reshape(cin, 1)
    t_f = _round_down(max(_GRAM_BUDGET // (16 * cin), 128), 128)
    t_f = min(max(t_f, 128), 1024, cout_p)
    n_f = pl.cdiv(cout_p, t_f)

    w_scaled = pl.pallas_call(
        _fold_scale_kernel,
        out_shape=jax.ShapeDtypeStruct((cin, cout_p), weights.dtype),
        grid_spec=pltpu.PrefetchScalarGridSpec(
            num_scalar_prefetch=0,
            grid=(n_f,),
            in_specs=[
                pl.BlockSpec((cin, t_f), lambda j: (0, j)),   # W^T column block
                pl.BlockSpec((cin, 1), lambda j: (0, 0)),     # rowsum (resident)
                pl.BlockSpec((cin, 1), lambda j: (0, 0)),     # q (resident)
            ],
            out_specs=pl.BlockSpec((cin, t_f), lambda j: (0, j)),
        ),
        compiler_params=pltpu.CompilerParams(
            dimension_semantics=("parallel",),
            vmem_limit_bytes=_VMEM_LIMIT),
    )(w_t, rowsum_col, q_col)

    # ---- 3. Hot path: out = x @ w_scaled + b on a 2-D (M, N) grid -----------
    # Weight tile (double-buffered) inside budget; keep the whole weight resident
    # (tn == cout_p, DMA'd once) whenever it fits.
    if 8 * cin * cout_p <= _W_TILE_BUDGET:
        tn = cout_p
    else:
        tn = max(128, min(_round_down(_W_TILE_BUDGET // (8 * cin), 128), cout_p))
    grid_n = pl.cdiv(cout_p, tn)

    # x and out tiles are each double-buffered: 8 * tm * (cin + tn) bytes.
    row_budget = max(_HOT_BUDGET - 8 * cin * tn, 8 * (cin + tn) * 8)
    tm = row_budget // (8 * (cin + tn))
    tm = max(8, min(_round_down(tm, 8), 2048, _round_up(m, 8)))
    grid_m = pl.cdiv(m, tm)          # no M padding: ragged tail block is masked

    cost = pl.CostEstimate(
        flops=2 * m * cin * cout_p,
        transcendentals=0,
        bytes_accessed=4 * (m * cin + m * cout_p
                            + (grid_m if grid_n > 1 else 1) * cin * cout_p + cout_p),
    )

    out = pl.pallas_call(
        _matmul_bias_kernel,
        out_shape=jax.ShapeDtypeStruct((m, cout_p), x.dtype),
        grid_spec=pltpu.PrefetchScalarGridSpec(
            num_scalar_prefetch=0,
            grid=(grid_m, grid_n),      # N innermost: x block index constant across j
            in_specs=[
                pl.BlockSpec((tm, cin), lambda i, j: (i, 0)),   # x tile (streamed over M)
                pl.BlockSpec((cin, tn), lambda i, j: (0, j)),   # (K, N) weight tile
                pl.BlockSpec((1, tn), lambda i, j: (0, j)),     # bias tile
            ],
            out_specs=pl.BlockSpec((tm, tn), lambda i, j: (i, j)),
        ),
        compiler_params=pltpu.CompilerParams(
            dimension_semantics=("parallel", "parallel"),   # megacore sharding on v7x
            vmem_limit_bytes=_VMEM_LIMIT),
        cost_estimate=cost,
    )(x2, w_scaled, b_p)

    if cout_p != cout:
        out = out[:, :cout]
    return out.reshape(*lead, cout)


def sdp_linear_ref(x, weights, bias, q):
    """Pure-JAX reference mirroring the torch forward."""
    q_ = q[:, None]
    qe = jnp.exp(q_)
    qi = jnp.exp(-q_)
    T = 1.0 / jnp.abs((qi * weights.T) @ weights * qe).sum(1)
    y = jnp.sqrt(T) * x
    return y @ weights.T + bias


if __name__ == "__main__":
    cin, cout = 32, 16
    batch, seq = 2, 8

    key = jax.random.PRNGKey(0)
    k_w, k_b, k_q, k_x = jax.random.split(key, 4)

    # xavier_normal_: std = sqrt(2 / (fan_in + fan_out))
    std = (2.0 / (cin + cout)) ** 0.5
    weights = std * jax.random.normal(k_w, (cout, cin), dtype=jnp.float32)

    # bias ~ U(-1/sqrt(fan_in), 1/sqrt(fan_in))
    bound = 1.0 / (cin ** 0.5)
    bias = jax.random.uniform(k_b, (cout,), dtype=jnp.float32,
                              minval=-bound, maxval=bound)

    # q ~ U(0, 1)  (torch.rand)
    q = jax.random.uniform(k_q, (cin,), dtype=jnp.float32)

    x = jax.random.normal(k_x, (batch, seq, cin), dtype=jnp.float32)

    out = jax.block_until_ready(sdp_linear(x, weights, bias, q))
    ref = jax.block_until_ready(sdp_linear_ref(x, weights, bias, q))

    assert out.shape == (batch, seq, cout), out.shape
    assert jnp.allclose(out, ref, rtol=1e-5, atol=1e-5), \
        float(jnp.max(jnp.abs(out - ref)))
    print("KERNEL_OK")
</pallas_src>

<mosaic_0001>
module attributes {stable_mosaic.version = 11 : i64} {
  func.func @_gram_rowsum_kernel(%arg0: i32, %arg1: i32, %arg2: memref<128x32xf32, #tpu.memory_space<vmem>>, %arg3: memref<128x32xf32, #tpu.memory_space<vmem>>, %arg4: memref<1x32xf32, #tpu.memory_space<vmem>>) attributes {dimension_semantics = [#tpu.dimension_semantics<parallel>, #tpu.dimension_semantics<arbitrary>], iteration_bounds = array<i64: 1, 1>, scalar_prefetch = 0 : i64, scratch_operands = 0 : i64, tpu.core_type = #tpu.core_type<tc>, window_params = [{transform_indices = @transform_0, window_bounds = array<i64: 128, 32>}, {transform_indices = @transform_1, window_bounds = array<i64: 128, 32>}, {transform_indices = @transform_2, window_bounds = array<i64: 1, 32>}]} {
    %c0_i32 = arith.constant 0 : i32
    %0 = arith.cmpi eq, %arg1, %c0_i32 : i32
    %1 = arith.extui %0 : i1 to i32
    %c0_i32_0 = arith.constant 0 : i32
    %2 = arith.cmpi ne, %1, %c0_i32_0 : i32
    scf.if %2 {
      %cst_9 = arith.constant 0.000000e+00 : f32
      %12 = vector.broadcast %cst_9 : f32 to vector<1x32xf32>
      %c0_10 = arith.constant 0 : index
      %c0_11 = arith.constant 0 : index
      %13 = vector.load %arg4[%c0_10, %c0_11] : memref<1x32xf32, #tpu.memory_space<vmem>>, vector<1x32xf32>
      tpu.vector_store %arg4[%c0_10, %c0_11], %12 {strides = array<i32>} : memref<1x32xf32, #tpu.memory_space<vmem>>, vector<1x32xf32>,
    } else {
    }
    %c0 = arith.constant 0 : index
    %c0_1 = arith.constant 0 : index
    %3 = vector.load %arg3[%c0, %c0_1] : memref<128x32xf32, #tpu.memory_space<vmem>>, vector<128x32xf32>
    %c0_2 = arith.constant 0 : index
    %c0_3 = arith.constant 0 : index
    %4 = vector.load %arg2[%c0_2, %c0_3] : memref<128x32xf32, #tpu.memory_space<vmem>>, vector<128x32xf32>
    %cst = arith.constant dense<0.000000e+00> : vector<32x32xf32>
    %5 = tpu.matmul %3, %4, %cst {dimension_numbers = #tpu.dot_dimension_numbers<[0], [0], [1], [1], [0, 1, 1, 1], [], []>} : vector<128x32xf32>, vector<128x32xf32>, vector<32x32xf32> -> vector<32x32xf32>
    %c0_4 = arith.constant 0 : index
    %c0_5 = arith.constant 0 : index
    %6 = vector.load %arg4[%c0_4, %c0_5] : memref<1x32xf32, #tpu.memory_space<vmem>>, vector<1x32xf32>
    %7 = math.absf %5 : vector<32x32xf32>
    %cst_6 = arith.constant dense<0.000000e+00> : vector<32xf32>
    %8 = vector.multi_reduction <add>, %7, %cst_6 [0] : vector<32x32xf32> to vector<32xf32>
    %9 = vector.shape_cast %8 : vector<32xf32> to vector<1x32xf32>
    %10 = arith.addf %6, %9 : vector<1x32xf32>
    %c0_7 = arith.constant 0 : index
    %c0_8 = arith.constant 0 : index
    %11 = vector.load %arg4[%c0_7, %c0_8] : memref<1x32xf32, #tpu.memory_space<vmem>>, vector<1x32xf32>
    tpu.vector_store %arg4[%c0_7, %c0_8], %10 {strides = array<i32>} : memref<1x32xf32, #tpu.memory_space<vmem>>, vector<1x32xf32>,
    return
  }
  func.func @transform_0(%arg0: i32, %arg1: i32) -> (i32, i32) {
    %c0_i32 = arith.constant 0 : i32
    %c0_i32_0 = arith.constant 0 : i32
    return %c0_i32, %arg0 : i32, i32
  }
  func.func @transform_1(%arg0: i32, %arg1: i32) -> (i32, i32) {
    %c0_i32 = arith.constant 0 : i32
    %c0_i32_0 = arith.constant 0 : i32
    return %c0_i32, %arg1 : i32, i32
  }
  func.func @transform_2(%arg0: i32, %arg1: i32) -> (i32, i32) {
    %c0_i32 = arith.constant 0 : i32
    %c0_i32_0 = arith.constant 0 : i32
    return %c0_i32, %arg0 : i32, i32
  }
}

</mosaic_0001>

<bundles_post_ra>
// kernel: tpu_custom_call.1
= control target key start
LH: loop header
LB: loop body
LE: loop exit
PB: predicated region body
PF: predicated region fallthrough
CT: control target
= control target key end

     0   :  { %s462_s0 = inlined_call_operand.vmem [shape: f32[128,32], index: 0, kind: input, shape index: {}]   ;;  %s463_s1 = inlined_call_operand.vmem [shape: f32[128,32], index: 1, kind: input, shape index: {}]   ;;  %s464_s2 = inlined_call_operand.hbm [shape: f32[1,32], index: 2, kind: output, shape index: {}]  }
   0x1   :  { %v18_v0 = vld [vmem:[%s463_s1] sm:$0xff]  ;;  %v19_v1 = vld [vmem:[%s463_s1 + $0x8] sm:$0xff]  ;;  %v20_v4 = vld [vmem:[%s463_s1 + $0x10] sm:$0xff] }
   0x2   :  { %50 = vxpose.xlu0.b32.start [1/16] (narrow) %v18_v0, 32  ;;  %v34_v2 = vld [vmem:[%s462_s0] sm:$0xff]  ;;  %v35_v3 = vld [vmem:[%s462_s0 + $0x8] sm:$0xff]  ;;  %v36_v6 = vld [vmem:[%s462_s0 + $0x10] sm:$0xff] }
   0x3   :  { %v261_v5 = vpack.c.bf16 %v35_v3, %v34_v2  ;;  %v37_v7 = vld [vmem:[%s462_s0 + $0x18] sm:$0xff]  ;;  %v38_v9 = vld [vmem:[%s462_s0 + $0x20] sm:$0xff]  ;;  %v39_v10 = vld [vmem:[%s462_s0 + $0x28] sm:$0xff] }
   0x4   :  { %v265_v8 = vpack.c.bf16 %v37_v7, %v36_v6  ;;  %v21_v11 = vld [vmem:[%s463_s1 + $0x18] sm:$0xff]  ;;  %v269_v12 = vpack.c.bf16 %v39_v10, %v38_v9 }
   0x5   :  { %262 = vmatprep.subr.bf16.mxu0 %v261_v5  ;;  %293 = vmatprep.subr.bf16.mxu1 %v261_v5 }
   0x6   :  { %51 = vxpose.xlu0.b32.cont [2/16] (narrow) %v19_v1, 32  ;;  %264 = vmatpush3.bf16.msra.mxu0 %v261_v5 }
   0x7   :  { %266 = vmatprep.subr.bf16.mxu0 %v265_v8  ;;  %301 = vmatpush3.bf16.msra.mxu1 %v261_v5 }
   0xa   :  { %52 = vxpose.xlu0.b32.cont [3/16] (narrow) %v20_v4, 32 }
   0xb   :  { %7 = vsyncpa [#allocation3], 0  ;;  %294 = vmatprep.subr.bf16.mxu1 %v265_v8  ;;  %v40_v13 = vld [vmem:[%s462_s0 + $0x30] sm:$0xff]  ;;  %v41_v14 = vld [vmem:[%s462_s0 + $0x38] sm:$0xff]  ;;  %268 = vmatpush3.bf16.msra.mxu0 %v265_v8  ;;  %vm16_vm0 = vcmask 253952   ;;  %v335_v44 = vmov 0.0  }
   0xc   :  { %v22_v15 = vld [vmem:[%s463_s1 + $0x20] sm:$0xff]  ;;  %270 = vmatprep.subr.bf16.mxu0 %v269_v12  ;;  %v273_v16 = vpack.c.bf16 %v41_v14, %v40_v13  ;;  %302 = vmatpush3.bf16.msra.mxu1 %v265_v8  ;;  %v43_v18 = vld [vmem:[%s462_s0 + $0x48] sm:$0xff]  ;;  %v44_v21 = vld [vmem:[%s462_s0 + $0x50] sm:$0xff]  ;;  %17 = vst.msk [vmem:[#allocation2] sm:$0x1] %vm16_vm0, %v335_v44  ;;  %vm172_vm1 = vcmask 261120  }
   0xd   :  { %295 = vmatprep.subr.bf16.mxu1 %v269_v12  ;;  %v42_v17 = vld [vmem:[%s462_s0 + $0x40] sm:$0xff]  ;;  %v23_v19 = vld [vmem:[%s463_s1 + $0x28] sm:$0xff]  ;;  %v45_v22 = vld [vmem:[%s462_s0 + $0x58] sm:$0xff] }
   0xe   :  { %53 = vxpose.xlu0.b32.cont [4/16] (narrow) %v21_v11, 32  ;;  %v277_v20 = vpack.c.bf16 %v43_v18, %v42_v17  ;;  %v24_v23 = vld [vmem:[%s463_s1 + $0x30] sm:$0xff]  ;;  %v281_v24 = vpack.c.bf16 %v45_v22, %v44_v21  ;;  %v46_v25 = vld [vmem:[%s462_s0 + $0x60] sm:$0xff]  ;;  %v47_v26 = vld [vmem:[%s462_s0 + $0x68] sm:$0xff] }
   0xf   :  { %272 = vmatpush3.bf16.msra.mxu0 %v269_v12  ;;  %v25_v27 = vld [vmem:[%s463_s1 + $0x38] sm:$0xff]  ;;  %v285_v28 = vpack.c.bf16 %v47_v26, %v46_v25  ;;  %v48_v29 = vld [vmem:[%s462_s0 + $0x70] sm:$0xff]  ;;  %v26_v31 = vld [vmem:[%s463_s1 + $0x40] sm:$0xff] }
  0x10   :  { %274 = vmatprep.subr.bf16.mxu0 %v273_v16  ;;  %303 = vmatpush3.bf16.msra.mxu1 %v269_v12  ;;  %v49_v30 = vld [vmem:[%s462_s0 + $0x78] sm:$0xff]  ;;  %v27_v33 = vld [vmem:[%s463_s1 + $0x48] sm:$0xff]  ;;  %v28_v34 = vld [vmem:[%s463_s1 + $0x50] sm:$0xff] }
  0x11   :  { %296 = vmatprep.subr.bf16.mxu1 %v273_v16  ;;  %v289_v32 = vpack.c.bf16 %v49_v30, %v48_v29  ;;  %v29_v35 = vld [vmem:[%s463_s1 + $0x58] sm:$0xff]  ;;  %v30_v36 = vld [vmem:[%s463_s1 + $0x60] sm:$0xff]  ;;  %v31_v37 = vld [vmem:[%s463_s1 + $0x68] sm:$0xff] }
  0x12   :  { %54 = vxpose.xlu0.b32.cont [5/16] (narrow) %v22_v15, 32  ;;  %v32_v38 = vld [vmem:[%s463_s1 + $0x70] sm:$0xff]  ;;  %v33_v39 = vld [vmem:[%s463_s1 + $0x78] sm:$0xff]  ;;  %s336_s1 = smov [#allocation2]  }
  0x13   :  { %276 = vmatpush3.bf16.msra.mxu0 %v273_v16  ;;  %v167_v1 = vld [vmem:[#allocation2] sm:$0x1]  ;;  %s195_s16 = sshll.u32 %s336_s1, 4  ;;  %s196_s16 = int_to_ptr.vmem [resolvable:$true] %s195_s16 }
  0x14   :  { %278 = vmatprep.subr.bf16.mxu0 %v277_v20  ;;  %304 = vmatpush3.bf16.msra.mxu1 %v273_v16  ;;  %s311_s17 = scalar_lea.vmem %s196_s16, 16  ;;  %s315_s18 = scalar_lea.vmem %s196_s16, 32 }
  0x15   :  { %297 = vmatprep.subr.bf16.mxu1 %v277_v20  ;;  %p312_p0 = scmp.ne.s32.totalorder %s196_s16, %s311_s17  ;;  %p316_p1 = scmp.lt.s32.totalorder %s196_s16, %s196_s16 }
  0x16   :  { %55 = vxpose.xlu0.b32.cont [6/16] (narrow) %v23_v19, 32  ;;  %p317_p2 = scmp.lt.s32.totalorder %s315_s18, %s311_s17 }
  0x17   :  { %280 = vmatpush3.bf16.msra.mxu0 %v277_v20 }
  0x18   :  { %282 = vmatprep.subr.bf16.mxu0 %v281_v24  ;;  %305 = vmatpush3.bf16.msra.mxu1 %v277_v20  ;;  %p318_p3 = por %p317_p2, %p316_p1 }
  0x19   :  { %298 = vmatprep.subr.bf16.mxu1 %v281_v24 }
  0x1a   :  { %56 = vxpose.xlu0.b32.cont [7/16] (narrow) %v24_v23, 32  ;;  %p319_p4 = pnand %p318_p3, %p312_p0 }
  0x1b   :  { %284 = vmatpush3.bf16.msra.mxu0 %v281_v24 }
  0x1c   :  { %286 = vmatprep.subr.bf16.mxu0 %v285_v28  ;;  %306 = vmatpush3.bf16.msra.mxu1 %v281_v24 }
  0x1d   :  { %299 = vmatprep.subr.bf16.mxu1 %v285_v28 }
  0x1e   :  { %57 = vxpose.xlu0.b32.cont [8/16] (narrow) %v25_v27, 32 }
  0x1f   :  { %288 = vmatpush3.bf16.msra.mxu0 %v285_v28 }
  0x20   :  { %290 = vmatprep.subr.bf16.mxu0 %v289_v32  ;;  %307 = vmatpush3.bf16.msra.mxu1 %v285_v28 }
  0x21   :  { %300 = vmatprep.subr.bf16.mxu1 %v289_v32 }
  0x22   :  { %58 = vxpose.xlu0.b32.cont [9/16] (narrow) %v26_v31, 32 }
  0x23   :  { %292 = vmatpush3.bf16.msra.mxu0 %v289_v32 }
  0x24   :  { %308 = vmatpush3.bf16.msra.mxu1 %v289_v32 }
  0x26   :  { %59 = vxpose.xlu0.b32.cont [10/16] (narrow) %v27_v33, 32 }
  0x2a   :  { %60 = vxpose.xlu0.b32.cont [11/16] (narrow) %v28_v34, 32 }
  0x2e   :  { %61 = vxpose.xlu0.b32.cont [12/16] (narrow) %v29_v35, 32 }
  0x32   :  { %62 = vxpose.xlu0.b32.cont [13/16] (narrow) %v30_v36, 32 }
  0x36   :  { %63 = vxpose.xlu0.b32.cont [14/16] (narrow) %v31_v37, 32 }
  0x3a   :  { %64 = vxpose.xlu0.b32.cont [15/16] (narrow) %v32_v38, 32 }
  0x3e   :  { %65 = vxpose.xlu0.b32.end [16/16] (narrow) %v33_v39, 32 }
  0x82   :  { %v66_v40 = vpop.trf.xlu0 }
  0x83   :  { %255 = vmatprep.mubr.f32.mxu0 %v66_v40 }
  0x86   :  { %v67_v41 = vpop.trf.xlu0 }
  0x87   :  { %256 = vmatmul.mubr.f32.vlgmr.msra.gmra.mrb[0].mxu0 %v67_v41 }
  0x8a   :  { %v68_v42 = vpop.trf.xlu0 }
  0x8b   :  { %258 = vmatprep.mubr.f32.mxu1 %v68_v42 }
  0x8e   :  { %v69_v43 = vpop.trf.xlu0 }
  0x8f   :  { %259 = vmatmul.mubr.f32.vlgmr.msra.gmra.mrb[0].mxu1 %v69_v43 }
 0x15a   :  { %v257_v45 = vpop.f32.mrb[0].mxu0 }
 0x15b   :  { %v169_v46 = vand.u32 2147483647, %v257_v45  ;;  %v148_v47 = vpop.f32.mrb[1].mxu0 }
 0x15c   :  { %v168_v48 = vand.u32 2147483647, %v148_v47 }
 0x15d   :  { %v174_v49 = vsel %vm172_vm1, %v169_v46, 0.0 }
 0x15e   :  { %v173_v50 = vsel %vm172_vm1, %v168_v48, 0.0 }
 0x15f   :  { %v175_v51 = vadd.f32 %v174_v49, %v173_v50 }
 0x162   :  { %v260_v52 = vpop.f32.mrb[0].mxu1 }
 0x163   :  { %v158_v53 = vpop.f32.mrb[1].mxu1  ;;  %v171_v54 = vand.u32 2147483647, %v260_v52 }
 0x164   :  { %v170_v55 = vand.u32 2147483647, %v158_v53 }
 0x165   :  { %v178_v58 = vsel %vm172_vm1, %v171_v54, 0.0 }
 0x166   :  { %v176_v56 = vsel %vm172_vm1, %v170_v55, 0.0 }
 0x167   :  { %v177_v57 = vadd.f32 %v176_v56, %v175_v51 }
 0x169   :  { %v179_v59 = vadd.f32 %v178_v58, %v177_v57 }
 0x16b   :  { %v180_v60 = vrot.slane %v179_v59, 4 }
 0x16d   :  { %v181_v61 = vadd.f32 %v180_v60, %v179_v59 }
 0x16f   :  { %v182_v62 = vrot.slane %v181_v61, 2 }
 0x171   :  { %v183_v63 = vadd.f32 %v182_v62, %v181_v61 }
 0x173   :  { %v184_v0 = vrot.slane %v183_v63, 1 }
 0x175   :  { %v185_v2 = vadd.f32 %v184_v0, %v183_v63 }
 0x177   :  { %v186_v3 = vadd.f32 %v185_v2, %v167_v1 }
 0x179   :  { %188 = vst.msk [vmem:[#allocation2] sm:$0x1] %vm16_vm0, %v186_v3 }
 0x17a   :  { %322 = shalt.err (!%p319_p4)
}
 0x17b   :  { %s323_s21 = scalar_lea.hbm %s464_s2, 16 }
 0x17c   :  { %p324_p5 = scmp.ne.s32.totalorder %s464_s2, %s323_s21  ;;  %p327_p6 = scmp.lt.u32.totalorder %s323_s21, %s464_s2 }
 0x17e   :  { %p329_p7 = pnand %p327_p6, %p324_p5 }
 0x180   :  { %332 = shalt.err (!%p329_p7)
}
 0x181   :  { %198 = dma.vmem_to_hbm [thread:$0]  %s196_s16, 16, %s464_s2, [#allocation3]  }
 0x182   :  { %333 = dma.done.wait [#allocation3], 16  }
 0x183   :  { %334 = vsyncadd [#allocation3], 4294967280 }
 0x184   :  { %202 = vsyncpa [#allocation3], 1 }

</bundles_post_ra>
